<compile_context>
chip_gen: v7x
topology: tpu7x:2x2x1
jax: 0.10.0
libtpu: 0.0.40
codegen_flags: <defaults>
</compile_context>

<pallas_src>
import functools

import jax
import jax.numpy as jnp
import numpy as np
from jax.experimental import pallas as pl
from jax.experimental.pallas import tpu as pltpu


def msa_flash_kernel(q_ref, k_ref, v_ref,
                     wq_ref, bq_ref, wk_ref, bk_ref, wv_ref, bv_ref,
                     o_ref,
                     q_sc, m_sc, l_sc, acc_sc):
    # Blocks:
    #   q_ref/k_ref/v_ref : (1, H, tq|tk, dh) bf16
    #   w*_ref            : (H, dh, dh) bf16   (wq pre-scaled by 1/sqrt(dh))
    #   b*_ref            : (H, 1, dh)  f32    (bq pre-scaled by 1/sqrt(dh))
    #   o_ref             : (1, tq, D)  bf16   (head-concatenated, lane-dense)
    # Scratch (persist across the KV grid axis):
    #   q_sc   : (H, tq, dh) bf16   cached projected Q for this query tile
    #   m_sc   : (H, tq, 1)  f32    running max
    #   l_sc   : (H, tq, 1)  f32    running softmax denominator
    #   acc_sc : (H, tq, dh) f32    running output accumulator
    ki = pl.program_id(2)

    @pl.when(ki == 0)
    def _init():
        # Per-head Q projection, all heads batched in one MXU einsum; the
        # 1/sqrt(dh) softmax scale is already folded into wq/bq.
        q = jnp.einsum('hsd,hde->hse', q_ref[0], wq_ref[...],
                       preferred_element_type=jnp.float32) + bq_ref[...]
        q_sc[...] = q.astype(jnp.bfloat16)
        m_sc[...] = jnp.full_like(m_sc, -jnp.inf)
        l_sc[...] = jnp.zeros_like(l_sc)
        acc_sc[...] = jnp.zeros_like(acc_sc)

    # Per-head K/V projections for this KV tile (bf16 MXU operands, f32 acc).
    k = (jnp.einsum('hsd,hde->hse', k_ref[0], wk_ref[...],
                    preferred_element_type=jnp.float32)
         + bk_ref[...]).astype(jnp.bfloat16)
    v = (jnp.einsum('hsd,hde->hse', v_ref[0], wv_ref[...],
                    preferred_element_type=jnp.float32)
         + bv_ref[...]).astype(jnp.bfloat16)

    # scores[h, i, j] = q[h, i, :] . k[h, j, :] -- contraction on last dims,
    # so no explicit transpose (no XLU permute / VMEM copy per head).
    s = jnp.einsum('hqd,hkd->hqk', q_sc[...], k,
                   preferred_element_type=jnp.float32)

    # Online (flash) softmax update.  exp stays f32 so the same kernel is
    # correct on v5e (no bf16 EUP); bf16 exp is a v6e/v7x-only micro-opt.
    m_prev = m_sc[...]
    m_new = jnp.maximum(m_prev, jnp.max(s, axis=-1, keepdims=True))
    alpha = jnp.exp(m_prev - m_new)
    p = jnp.exp(s - m_new)
    l_sc[...] = alpha * l_sc[...] + jnp.sum(p, axis=-1, keepdims=True)
    acc_sc[...] = alpha * acc_sc[...] + jnp.einsum(
        'hqk,hkd->hqd', p.astype(jnp.bfloat16), v,
        preferred_element_type=jnp.float32)
    m_sc[...] = m_new

    @pl.when(ki == pl.num_programs(2) - 1)
    def _finalize():
        out = acc_sc[...] * pl.reciprocal(l_sc[...], approx=True)  # (H, tq, dh)
        H = out.shape[0]
        dh = out.shape[2]
        # Head concat (torch.hstack equivalent): per-head static lane-window
        # stores into the dense (1, tq, D) VMEM output block; the HBM writeback
        # DMA is a single lane-dense bf16 slab (no wrapper-side transpose).
        for h in range(H):
            o_ref[0, :, h * dh:(h + 1) * dh] = out[h].astype(o_ref.dtype)


def my_msa(Q, K, V, params, *, n_heads, q_tile=256, kv_tile=256):
    """Pallas implementation of MyMSA.forward(Q, K, V) for (B, S, D) inputs."""
    B, S, D = Q.shape
    H = n_heads
    assert D % H == 0
    dh = D // H
    tq = min(q_tile, S)
    tk = min(kv_tile, S)
    assert S % tq == 0 and S % tk == 0, "sequence must divide the tile sizes"

    scale = 1.0 / float(np.sqrt(dh))

    def to_heads(x):
        # (B, S, D) -> (B, H, S, dh) bf16.  NOTE: in a full model, keep
        # activations in this layout end-to-end to avoid this extra HBM pass;
        # here the module interface is (B, S, D) f32, so the cast+transpose is
        # one fused relayout done by XLA.
        return jnp.transpose(x.reshape(B, S, H, dh), (0, 2, 1, 3)).astype(jnp.bfloat16)

    qh, kh, vh = to_heads(Q), to_heads(K), to_heads(V)

    # Fold the 1/sqrt(dh) softmax scale into the Q projection (weight + bias)
    # in f32, then cast weights to bf16 for the MXU.
    wq = (params["wq"] * scale).astype(jnp.bfloat16)
    bq = params["bq"] * scale
    wk = params["wk"].astype(jnp.bfloat16)
    bk = params["bk"]
    wv = params["wv"].astype(jnp.bfloat16)
    bv = params["bv"]

    grid = (B, S // tq, S // tk)

    q_spec = pl.BlockSpec((1, H, tq, dh), lambda b, qi, ki: (b, 0, qi, 0))
    kv_spec = pl.BlockSpec((1, H, tk, dh), lambda b, qi, ki: (b, 0, ki, 0))
    w_spec = pl.BlockSpec((H, dh, dh), lambda b, qi, ki: (0, 0, 0))
    b_spec = pl.BlockSpec((H, 1, dh), lambda b, qi, ki: (0, 0, 0))
    out_spec = pl.BlockSpec((1, tq, D), lambda b, qi, ki: (b, qi, 0))

    out = pl.pallas_call(
        msa_flash_kernel,
        out_shape=jax.ShapeDtypeStruct((B, S, D), jnp.bfloat16),
        grid=grid,
        in_specs=[q_spec, kv_spec, kv_spec,
                  w_spec, b_spec,        # Wq, bq (pre-scaled)
                  w_spec, b_spec,        # Wk, bk
                  w_spec, b_spec],       # Wv, bv
        out_specs=out_spec,
        scratch_shapes=[
            pltpu.VMEM((H, tq, dh), jnp.bfloat16),   # cached projected Q tile
            pltpu.VMEM((H, tq, 1), jnp.float32),     # running max
            pltpu.VMEM((H, tq, 1), jnp.float32),     # running denominator
            pltpu.VMEM((H, tq, dh), jnp.float32),    # output accumulator
        ],
        compiler_params=pltpu.CompilerParams(
            # batch and q-tile axes parallel (keeps both v7x TCs busy even at
            # small B); KV axis is the reduction -> arbitrary, and innermost.
            dimension_semantics=("parallel", "parallel", "arbitrary"),
            # Explicit scoped-VMEM limit with headroom for double-buffered
            # inputs; safely under v7x's 64 MiB physical VMEM.
            vmem_limit_bytes=48 * 1024 * 1024),
    )(qh, kh, vh, wq, bq, wk, bk, wv, bv)

    return out  # (B, S, D) bf16, heads already concatenated


def init_params(key, d, n_heads):
    """Per-head nn.Linear(d_head, d_head) weights, pre-transposed (x @ W_h)
    and stored head-leading, all in f32 (matching the PyTorch module)."""
    dh = d // n_heads
    ks = jax.random.split(key, 6)

    def proj(kw, kb):
        w = 0.05 * jax.random.normal(kw, (n_heads, dh, dh), jnp.float32)
        b = 0.05 * jax.random.normal(kb, (n_heads, 1, dh), jnp.float32)
        return w, b

    wq, bq = proj(ks[0], ks[1])
    wk, bk = proj(ks[2], ks[3])
    wv, bv = proj(ks[4], ks[5])
    return dict(wq=wq, bq=bq, wk=wk, bk=bk, wv=wv, bv=bv)


def reference_msa(Q, K, V, p, n_heads):
    """Pure-JAX f32 reference matching MyMSA.forward semantics (mask=None)."""
    B, S, D = Q.shape
    dh = D // n_heads
    heads = []
    for h in range(n_heads):
        sl = slice(h * dh, (h + 1) * dh)
        q = Q[..., sl] @ p["wq"][h] + p["bq"][h]
        k = K[..., sl] @ p["wk"][h] + p["bk"][h]
        v = V[..., sl] @ p["wv"][h] + p["bv"][h]
        att = jax.nn.softmax(
            jnp.einsum('bqd,bkd->bqk', q, k) / np.sqrt(dh), axis=-1)
        heads.append(jnp.einsum('bqk,bkd->bqd', att, v))
    return jnp.concatenate(heads, axis=-1)


if __name__ == "__main__":
    B, S, D = 2, 8, 32
    N_HEADS = 2

    key = jax.random.PRNGKey(0)
    kq, kk, kv, kp = jax.random.split(key, 4)
    Q = jax.random.normal(kq, (B, S, D), jnp.float32)
    K = jax.random.normal(kk, (B, S, D), jnp.float32)
    V = jax.random.normal(kv, (B, S, D), jnp.float32)
    params = init_params(kp, D, N_HEADS)

    out = my_msa(Q, K, V, params, n_heads=N_HEADS)
    out = jax.block_until_ready(out)

    ref = reference_msa(Q, K, V, params, N_HEADS)
    # bf16 MXU operands / bf16 output (f32 accumulation) -> loosened tolerance
    # vs the f32 reference.
    np.testing.assert_allclose(np.asarray(out, dtype=np.float32),
                               np.asarray(ref),
                               rtol=2e-2, atol=2e-2)

    print("KERNEL_OK")
</pallas_src>

<mosaic_0001>
module attributes {stable_mosaic.version = 11 : i64} {
  func.func @msa_flash_kernel(%arg0: i32, %arg1: i32, %arg2: i32, %arg3: memref<1x2x8x16xbf16, #tpu.memory_space<vmem>>, %arg4: memref<1x2x8x16xbf16, #tpu.memory_space<vmem>>, %arg5: memref<1x2x8x16xbf16, #tpu.memory_space<vmem>>, %arg6: memref<2x16x16xbf16, #tpu.memory_space<vmem>>, %arg7: memref<2x1x16xf32, #tpu.memory_space<vmem>>, %arg8: memref<2x16x16xbf16, #tpu.memory_space<vmem>>, %arg9: memref<2x1x16xf32, #tpu.memory_space<vmem>>, %arg10: memref<2x16x16xbf16, #tpu.memory_space<vmem>>, %arg11: memref<2x1x16xf32, #tpu.memory_space<vmem>>, %arg12: memref<1x8x32xbf16, #tpu.memory_space<vmem>>, %arg13: memref<2x8x16xbf16, #tpu.memory_space<vmem>>, %arg14: memref<2x8x1xf32, #tpu.memory_space<vmem>>, %arg15: memref<2x8x1xf32, #tpu.memory_space<vmem>>, %arg16: memref<2x8x16xf32, #tpu.memory_space<vmem>>) attributes {dimension_semantics = [#tpu.dimension_semantics<parallel>, #tpu.dimension_semantics<parallel>, #tpu.dimension_semantics<arbitrary>], iteration_bounds = array<i64: 2, 1, 1>, scalar_prefetch = 0 : i64, scratch_operands = 4 : i64, tpu.core_type = #tpu.core_type<tc>, window_params = [{transform_indices = @transform_0, window_bounds = array<i64: 1, 2, 8, 16>}, {transform_indices = @transform_1, window_bounds = array<i64: 1, 2, 8, 16>}, {transform_indices = @transform_2, window_bounds = array<i64: 1, 2, 8, 16>}, {pipeline_mode = #tpu.pipeline_mode<synchronous>, transform_indices = @transform_3, window_bounds = array<i64: 2, 16, 16>}, {pipeline_mode = #tpu.pipeline_mode<synchronous>, transform_indices = @transform_4, window_bounds = array<i64: 2, 1, 16>}, {pipeline_mode = #tpu.pipeline_mode<synchronous>, transform_indices = @transform_5, window_bounds = array<i64: 2, 16, 16>}, {pipeline_mode = #tpu.pipeline_mode<synchronous>, transform_indices = @transform_6, window_bounds = array<i64: 2, 1, 16>}, {pipeline_mode = #tpu.pipeline_mode<synchronous>, transform_indices = @transform_7, window_bounds = array<i64: 2, 16, 16>}, {pipeline_mode = #tpu.pipeline_mode<synchronous>, transform_indices = @transform_8, window_bounds = array<i64: 2, 1, 16>}, {transform_indices = @transform_9, window_bounds = array<i64: 1, 8, 32>}]} {
    %c0_i32 = arith.constant 0 : i32
    %0 = arith.cmpi eq, %arg2, %c0_i32 : i32
    %1 = arith.extui %0 : i1 to i32
    %c0_i32_0 = arith.constant 0 : i32
    %2 = arith.cmpi ne, %1, %c0_i32_0 : i32
    scf.if %2 {
      %c0_48 = arith.constant 0 : index
      %c0_49 = arith.constant 0 : index
      %c0_50 = arith.constant 0 : index
      %c0_51 = arith.constant 0 : index
      %47 = vector.load %arg3[%c0_48, %c0_49, %c0_50, %c0_51] : memref<1x2x8x16xbf16, #tpu.memory_space<vmem>>, vector<1x2x8x16xbf16>
      %48 = vector.shape_cast %47 : vector<1x2x8x16xbf16> to vector<2x8x16xbf16>
      %c0_52 = arith.constant 0 : index
      %c0_53 = arith.constant 0 : index
      %c0_54 = arith.constant 0 : index
      %49 = vector.load %arg6[%c0_52, %c0_53, %c0_54] : memref<2x16x16xbf16, #tpu.memory_space<vmem>>, vector<2x16x16xbf16>
      "tpu.trace_start"() <{level = 10 : i32, message = "hsd,hde->hse"}> : () -> ()
      %cst_55 = arith.constant dense<0.000000e+00> : vector<2x8x16xf32>
      %50 = tpu.matmul %48, %49, %cst_55 {dimension_numbers = #tpu.dot_dimension_numbers<[2], [1], [1], [2], [0, 0, 0, 1, 1, 2], [0], [0]>} : vector<2x8x16xbf16>, vector<2x16x16xbf16>, vector<2x8x16xf32> -> vector<2x8x16xf32>
      "tpu.trace_stop"() : () -> ()
      %c0_56 = arith.constant 0 : index
      %c0_57 = arith.constant 0 : index
      %c0_58 = arith.constant 0 : index
      %51 = vector.load %arg7[%c0_56, %c0_57, %c0_58] : memref<2x1x16xf32, #tpu.memory_space<vmem>>, vector<2x1x16xf32>
      %52 = vector.broadcast %51 : vector<2x1x16xf32> to vector<2x8x16xf32>
      %53 = arith.addf %50, %52 : vector<2x8x16xf32>
      %54 = arith.truncf %53 : vector<2x8x16xf32> to vector<2x8x16xbf16>
      %c0_59 = arith.constant 0 : index
      %c0_60 = arith.constant 0 : index
      %c0_61 = arith.constant 0 : index
      %55 = vector.load %arg13[%c0_59, %c0_60, %c0_61] : memref<2x8x16xbf16, #tpu.memory_space<vmem>>, vector<2x8x16xbf16>
      tpu.vector_store %arg13[%c0_59, %c0_60, %c0_61], %54 {strides = array<i32>} : memref<2x8x16xbf16, #tpu.memory_space<vmem>>, vector<2x8x16xbf16>,
      %cst_62 = arith.constant 0xFF800000 : f32
      %56 = vector.broadcast %cst_62 : f32 to vector<2x8x1xf32>
      %c0_63 = arith.constant 0 : index
      %c0_64 = arith.constant 0 : index
      %c0_65 = arith.constant 0 : index
      %57 = vector.load %arg14[%c0_63, %c0_64, %c0_65] : memref<2x8x1xf32, #tpu.memory_space<vmem>>, vector<2x8x1xf32>
      tpu.vector_store %arg14[%c0_63, %c0_64, %c0_65], %56 {strides = array<i32>} : memref<2x8x1xf32, #tpu.memory_space<vmem>>, vector<2x8x1xf32>,
      %cst_66 = arith.constant 0.000000e+00 : f32
      %58 = vector.broadcast %cst_66 : f32 to vector<2x8x1xf32>
      %c0_67 = arith.constant 0 : index
      %c0_68 = arith.constant 0 : index
      %c0_69 = arith.constant 0 : index
      %59 = vector.load %arg15[%c0_67, %c0_68, %c0_69] : memref<2x8x1xf32, #tpu.memory_space<vmem>>, vector<2x8x1xf32>
      tpu.vector_store %arg15[%c0_67, %c0_68, %c0_69], %58 {strides = array<i32>} : memref<2x8x1xf32, #tpu.memory_space<vmem>>, vector<2x8x1xf32>,
      %cst_70 = arith.constant 0.000000e+00 : f32
      %60 = vector.broadcast %cst_70 : f32 to vector<2x8x16xf32>
      %c0_71 = arith.constant 0 : index
      %c0_72 = arith.constant 0 : index
      %c0_73 = arith.constant 0 : index
      %61 = vector.load %arg16[%c0_71, %c0_72, %c0_73] : memref<2x8x16xf32, #tpu.memory_space<vmem>>, vector<2x8x16xf32>
      tpu.vector_store %arg16[%c0_71, %c0_72, %c0_73], %60 {strides = array<i32>} : memref<2x8x16xf32, #tpu.memory_space<vmem>>, vector<2x8x16xf32>,
    } else {
    }
    %c0 = arith.constant 0 : index
    %c0_1 = arith.constant 0 : index
    %c0_2 = arith.constant 0 : index
    %c0_3 = arith.constant 0 : index
    %3 = vector.load %arg4[%c0, %c0_1, %c0_2, %c0_3] : memref<1x2x8x16xbf16, #tpu.memory_space<vmem>>, vector<1x2x8x16xbf16>
    %4 = vector.shape_cast %3 : vector<1x2x8x16xbf16> to vector<2x8x16xbf16>
    %c0_4 = arith.constant 0 : index
    %c0_5 = arith.constant 0 : index
    %c0_6 = arith.constant 0 : index
    %5 = vector.load %arg8[%c0_4, %c0_5, %c0_6] : memref<2x16x16xbf16, #tpu.memory_space<vmem>>, vector<2x16x16xbf16>
    "tpu.trace_start"() <{level = 10 : i32, message = "hsd,hde->hse"}> : () -> ()
    %cst = arith.constant dense<0.000000e+00> : vector<2x8x16xf32>
    %6 = tpu.matmul %4, %5, %cst {dimension_numbers = #tpu.dot_dimension_numbers<[2], [1], [1], [2], [0, 0, 0, 1, 1, 2], [0], [0]>} : vector<2x8x16xbf16>, vector<2x16x16xbf16>, vector<2x8x16xf32> -> vector<2x8x16xf32>
    "tpu.trace_stop"() : () -> ()
    %c0_7 = arith.constant 0 : index
    %c0_8 = arith.constant 0 : index
    %c0_9 = arith.constant 0 : index
    %7 = vector.load %arg9[%c0_7, %c0_8, %c0_9] : memref<2x1x16xf32, #tpu.memory_space<vmem>>, vector<2x1x16xf32>
    %8 = vector.broadcast %7 : vector<2x1x16xf32> to vector<2x8x16xf32>
    %9 = arith.addf %6, %8 : vector<2x8x16xf32>
    %10 = arith.truncf %9 : vector<2x8x16xf32> to vector<2x8x16xbf16>
    %c0_10 = arith.constant 0 : index
    %c0_11 = arith.constant 0 : index
    %c0_12 = arith.constant 0 : index
    %c0_13 = arith.constant 0 : index
    %11 = vector.load %arg5[%c0_10, %c0_11, %c0_12, %c0_13] : memref<1x2x8x16xbf16, #tpu.memory_space<vmem>>, vector<1x2x8x16xbf16>
    %12 = vector.shape_cast %11 : vector<1x2x8x16xbf16> to vector<2x8x16xbf16>
    %c0_14 = arith.constant 0 : index
    %c0_15 = arith.constant 0 : index
    %c0_16 = arith.constant 0 : index
    %13 = vector.load %arg10[%c0_14, %c0_15, %c0_16] : memref<2x16x16xbf16, #tpu.memory_space<vmem>>, vector<2x16x16xbf16>
    "tpu.trace_start"() <{level = 10 : i32, message = "hsd,hde->hse"}> : () -> ()
    %cst_17 = arith.constant dense<0.000000e+00> : vector<2x8x16xf32>
    %14 = tpu.matmul %12, %13, %cst_17 {dimension_numbers = #tpu.dot_dimension_numbers<[2], [1], [1], [2], [0, 0, 0, 1, 1, 2], [0], [0]>} : vector<2x8x16xbf16>, vector<2x16x16xbf16>, vector<2x8x16xf32> -> vector<2x8x16xf32>
    "tpu.trace_stop"() : () -> ()
    %c0_18 = arith.constant 0 : index
    %c0_19 = arith.constant 0 : index
    %c0_20 = arith.constant 0 : index
    %15 = vector.load %arg11[%c0_18, %c0_19, %c0_20] : memref<2x1x16xf32, #tpu.memory_space<vmem>>, vector<2x1x16xf32>
    %16 = vector.broadcast %15 : vector<2x1x16xf32> to vector<2x8x16xf32>
    %17 = arith.addf %14, %16 : vector<2x8x16xf32>
    %18 = arith.truncf %17 : vector<2x8x16xf32> to vector<2x8x16xbf16>
    %c0_21 = arith.constant 0 : index
    %c0_22 = arith.constant 0 : index
    %c0_23 = arith.constant 0 : index
    %19 = vector.load %arg13[%c0_21, %c0_22, %c0_23] : memref<2x8x16xbf16, #tpu.memory_space<vmem>>, vector<2x8x16xbf16>
    "tpu.trace_start"() <{level = 10 : i32, message = "hqd,hkd->hqk"}> : () -> ()
    %cst_24 = arith.constant dense<0.000000e+00> : vector<2x8x8xf32>
    %20 = tpu.matmul %19, %10, %cst_24 {dimension_numbers = #tpu.dot_dimension_numbers<[2], [2], [1], [1], [0, 0, 0, 1, 1, 1], [0], [0]>} : vector<2x8x16xbf16>, vector<2x8x16xbf16>, vector<2x8x8xf32> -> vector<2x8x8xf32>
    "tpu.trace_stop"() : () -> ()
    %c0_25 = arith.constant 0 : index
    %c0_26 = arith.constant 0 : index
    %c0_27 = arith.constant 0 : index
    %21 = vector.load %arg14[%c0_25, %c0_26, %c0_27] : memref<2x8x1xf32, #tpu.memory_space<vmem>>, vector<2x8x1xf32>
    %cst_28 = arith.constant dense<0xFF800000> : vector<2x8xf32>
    %22 = vector.multi_reduction <maximumf>, %20, %cst_28 [2] : vector<2x8x8xf32> to vector<2x8xf32>
    %23 = vector.shape_cast %22 : vector<2x8xf32> to vector<2x8x1xf32>
    %24 = arith.maximumf %21, %23 : vector<2x8x1xf32>
    %25 = arith.subf %21, %24 : vector<2x8x1xf32>
    %26 = math.exp %25 : vector<2x8x1xf32>
    %27 = vector.broadcast %24 : vector<2x8x1xf32> to vector<2x8x8xf32>
    %28 = arith.subf %20, %27 : vector<2x8x8xf32>
    %29 = math.exp %28 : vector<2x8x8xf32>
    %c0_29 = arith.constant 0 : index
    %c0_30 = arith.constant 0 : index
    %c0_31 = arith.constant 0 : index
    %30 = vector.load %arg15[%c0_29, %c0_30, %c0_31] : memref<2x8x1xf32, #tpu.memory_space<vmem>>, vector<2x8x1xf32>
    %31 = arith.mulf %26, %30 : vector<2x8x1xf32>
    %cst_32 = arith.constant dense<0.000000e+00> : vector<2x8xf32>
    %32 = vector.multi_reduction <add>, %29, %cst_32 [2] : vector<2x8x8xf32> to vector<2x8xf32>
    %33 = vector.shape_cast %32 : vector<2x8xf32> to vector<2x8x1xf32>
    %34 = arith.addf %31, %33 : vector<2x8x1xf32>
    %c0_33 = arith.constant 0 : index
    %c0_34 = arith.constant 0 : index
    %c0_35 = arith.constant 0 : index
    %35 = vector.load %arg15[%c0_33, %c0_34, %c0_35] : memref<2x8x1xf32, #tpu.memory_space<vmem>>, vector<2x8x1xf32>
    tpu.vector_store %arg15[%c0_33, %c0_34, %c0_35], %34 {strides = array<i32>} : memref<2x8x1xf32, #tpu.memory_space<vmem>>, vector<2x8x1xf32>,
    %c0_36 = arith.constant 0 : index
    %c0_37 = arith.constant 0 : index
    %c0_38 = arith.constant 0 : index
    %36 = vector.load %arg16[%c0_36, %c0_37, %c0_38] : memref<2x8x16xf32, #tpu.memory_space<vmem>>, vector<2x8x16xf32>
    %37 = vector.broadcast %26 : vector<2x8x1xf32> to vector<2x8x16xf32>
    %38 = arith.mulf %37, %36 : vector<2x8x16xf32>
    %39 = arith.truncf %29 : vector<2x8x8xf32> to vector<2x8x8xbf16>
    "tpu.trace_start"() <{level = 10 : i32, message = "hqk,hkd->hqd"}> : () -> ()
    %cst_39 = arith.constant dense<0.000000e+00> : vector<2x8x16xf32>
    %40 = tpu.matmul %39, %18, %cst_39 {dimension_numbers = #tpu.dot_dimension_numbers<[2], [1], [1], [2], [0, 0, 0, 1, 1, 2], [0], [0]>} : vector<2x8x8xbf16>, vector<2x8x16xbf16>, vector<2x8x16xf32> -> vector<2x8x16xf32>
    "tpu.trace_stop"() : () -> ()
    %41 = arith.addf %38, %40 : vector<2x8x16xf32>
    %c0_40 = arith.constant 0 : index
    %c0_41 = arith.constant 0 : index
    %c0_42 = arith.constant 0 : index
    %42 = vector.load %arg16[%c0_40, %c0_41, %c0_42] : memref<2x8x16xf32, #tpu.memory_space<vmem>>, vector<2x8x16xf32>
    tpu.vector_store %arg16[%c0_40, %c0_41, %c0_42], %41 {strides = array<i32>} : memref<2x8x16xf32, #tpu.memory_space<vmem>>, vector<2x8x16xf32>,
    %c0_43 = arith.constant 0 : index
    %c0_44 = arith.constant 0 : index
    %c0_45 = arith.constant 0 : index
    %43 = vector.load %arg14[%c0_43, %c0_44, %c0_45] : memref<2x8x1xf32, #tpu.memory_space<vmem>>, vector<2x8x1xf32>
    tpu.vector_store %arg14[%c0_43, %c0_44, %c0_45], %24 {strides = array<i32>} : memref<2x8x1xf32, #tpu.memory_space<vmem>>, vector<2x8x1xf32>,
    %c0_i32_46 = arith.constant 0 : i32
    %44 = arith.cmpi eq, %arg2, %c0_i32_46 : i32
    %45 = arith.extui %44 : i1 to i32
    %c0_i32_47 = arith.constant 0 : i32
    %46 = arith.cmpi ne, %45, %c0_i32_47 : i32
    scf.if %46 {
      %c0_48 = arith.constant 0 : index
      %c0_49 = arith.constant 0 : index
      %c0_50 = arith.constant 0 : index
      %47 = vector.load %arg16[%c0_48, %c0_49, %c0_50] : memref<2x8x16xf32, #tpu.memory_space<vmem>>, vector<2x8x16xf32>
      %c0_51 = arith.constant 0 : index
      %c0_52 = arith.constant 0 : index
      %c0_53 = arith.constant 0 : index
      %48 = vector.load %arg15[%c0_51, %c0_52, %c0_53] : memref<2x8x1xf32, #tpu.memory_space<vmem>>, vector<2x8x1xf32>
      %49 = tpu.reciprocal %48 {approx = true} : vector<2x8x1xf32> -> vector<2x8x1xf32>
      %50 = vector.broadcast %49 : vector<2x8x1xf32> to vector<2x8x16xf32>
      %51 = arith.mulf %47, %50 : vector<2x8x16xf32>
      %52 = vector.extract_strided_slice %51 {offsets = [0, 0, 0], sizes = [1, 8, 16], strides = [1, 1, 1]} : vector<2x8x16xf32> to vector<1x8x16xf32>
      %53 = vector.shape_cast %52 : vector<1x8x16xf32> to vector<8x16xf32>
      %54 = arith.truncf %53 : vector<8x16xf32> to vector<8x16xbf16>
      %c0_54 = arith.constant 0 : index
      %c0_55 = arith.constant 0 : index
      %c0_56 = arith.constant 0 : index
      %55 = vector.load %arg12[%c0_54, %c0_55, %c0_56] : memref<1x8x32xbf16, #tpu.memory_space<vmem>>, vector<1x8x16xbf16>
      %56 = vector.shape_cast %55 : vector<1x8x16xbf16> to vector<8x16xbf16>
      %57 = vector.shape_cast %54 : vector<8x16xbf16> to vector<1x8x16xbf16>
      tpu.vector_store %arg12[%c0_54, %c0_55, %c0_56], %57 {strides = array<i32>} : memref<1x8x32xbf16, #tpu.memory_space<vmem>>, vector<1x8x16xbf16>,
      %58 = vector.extract_strided_slice %51 {offsets = [1, 0, 0], sizes = [1, 8, 16], strides = [1, 1, 1]} : vector<2x8x16xf32> to vector<1x8x16xf32>
      %59 = vector.shape_cast %58 : vector<1x8x16xf32> to vector<8x16xf32>
      %60 = arith.truncf %59 : vector<8x16xf32> to vector<8x16xbf16>
      %c0_57 = arith.constant 0 : index
      %c0_58 = arith.constant 0 : index
      %c16 = arith.constant 16 : index
      %61 = vector.load %arg12[%c0_57, %c0_58, %c16] : memref<1x8x32xbf16, #tpu.memory_space<vmem>>, vector<1x8x16xbf16>
      %62 = vector.shape_cast %61 : vector<1x8x16xbf16> to vector<8x16xbf16>
      %63 = vector.shape_cast %60 : vector<8x16xbf16> to vector<1x8x16xbf16>
      tpu.vector_store %arg12[%c0_57, %c0_58, %c16], %63 {strides = array<i32>} : memref<1x8x32xbf16, #tpu.memory_space<vmem>>, vector<1x8x16xbf16>,
    } else {
    }
    return
  }
  func.func @transform_0(%arg0: i32, %arg1: i32, %arg2: i32) -> (i32, i32, i32, i32) {
    %c0_i32 = arith.constant 0 : i32
    %c0_i32_0 = arith.constant 0 : i32
    %c0_i32_1 = arith.constant 0 : i32
    return %arg0, %c0_i32, %arg1, %c0_i32_0 : i32, i32, i32, i32
  }
  func.func @transform_1(%arg0: i32, %arg1: i32, %arg2: i32) -> (i32, i32, i32, i32) {
    %c0_i32 = arith.constant 0 : i32
    %c0_i32_0 = arith.constant 0 : i32
    %c0_i32_1 = arith.constant 0 : i32
    return %arg0, %c0_i32, %arg2, %c0_i32_0 : i32, i32, i32, i32
  }
  func.func @transform_2(%arg0: i32, %arg1: i32, %arg2: i32) -> (i32, i32, i32, i32) {
    %c0_i32 = arith.constant 0 : i32
    %c0_i32_0 = arith.constant 0 : i32
    %c0_i32_1 = arith.constant 0 : i32
    return %arg0, %c0_i32, %arg2, %c0_i32_0 : i32, i32, i32, i32
  }
  func.func @transform_3(%arg0: i32, %arg1: i32, %arg2: i32) -> (i32, i32, i32) {
    %c0_i32 = arith.constant 0 : i32
    %c0_i32_0 = arith.constant 0 : i32
    %c0_i32_1 = arith.constant 0 : i32
    %c0_i32_2 = arith.constant 0 : i32
    return %c0_i32, %c0_i32_0, %c0_i32_1 : i32, i32, i32
  }
  func.func @transform_4(%arg0: i32, %arg1: i32, %arg2: i32) -> (i32, i32, i32) {
    %c0_i32 = arith.constant 0 : i32
    %c0_i32_0 = arith.constant 0 : i32
    %c0_i32_1 = arith.constant 0 : i32
    %c0_i32_2 = arith.constant 0 : i32
    return %c0_i32, %c0_i32_0, %c0_i32_1 : i32, i32, i32
  }
  func.func @transform_5(%arg0: i32, %arg1: i32, %arg2: i32) -> (i32, i32, i32) {
    %c0_i32 = arith.constant 0 : i32
    %c0_i32_0 = arith.constant 0 : i32
    %c0_i32_1 = arith.constant 0 : i32
    %c0_i32_2 = arith.constant 0 : i32
    return %c0_i32, %c0_i32_0, %c0_i32_1 : i32, i32, i32
  }
  func.func @transform_6(%arg0: i32, %arg1: i32, %arg2: i32) -> (i32, i32, i32) {
    %c0_i32 = arith.constant 0 : i32
    %c0_i32_0 = arith.constant 0 : i32
    %c0_i32_1 = arith.constant 0 : i32
    %c0_i32_2 = arith.constant 0 : i32
    return %c0_i32, %c0_i32_0, %c0_i32_1 : i32, i32, i32
  }
  func.func @transform_7(%arg0: i32, %arg1: i32, %arg2: i32) -> (i32, i32, i32) {
    %c0_i32 = arith.constant 0 : i32
    %c0_i32_0 = arith.constant 0 : i32
    %c0_i32_1 = arith.constant 0 : i32
    %c0_i32_2 = arith.constant 0 : i32
    return %c0_i32, %c0_i32_0, %c0_i32_1 : i32, i32, i32
  }
  func.func @transform_8(%arg0: i32, %arg1: i32, %arg2: i32) -> (i32, i32, i32) {
    %c0_i32 = arith.constant 0 : i32
    %c0_i32_0 = arith.constant 0 : i32
    %c0_i32_1 = arith.constant 0 : i32
    %c0_i32_2 = arith.constant 0 : i32
    return %c0_i32, %c0_i32_0, %c0_i32_1 : i32, i32, i32
  }
  func.func @transform_9(%arg0: i32, %arg1: i32, %arg2: i32) -> (i32, i32, i32) {
    %c0_i32 = arith.constant 0 : i32
    %c0_i32_0 = arith.constant 0 : i32
    return %arg0, %arg1, %c0_i32 : i32, i32, i32
  }
}

</mosaic_0001>

<bundles_post_ra>
// kernel: tpu_custom_call.1
= control target key start
LH: loop header
LB: loop body
LE: loop exit
PB: predicated region body
PF: predicated region fallthrough
CT: control target
= control target key end

     0   :  { %s2328_s0 = inlined_call_operand.hbm [shape: bf16[2,2,8,16], index: 0, kind: input, shape index: {}]   ;;  %s2329_s1 = inlined_call_operand.hbm [shape: bf16[2,2,8,16], index: 1, kind: input, shape index: {}]   ;;  %s2330_s2 = inlined_call_operand.hbm [shape: bf16[2,2,8,16], index: 2, kind: input, shape index: {}]   ;;  %s2331_s3 = inlined_call_operand.hbm [shape: bf16[2,16,16], index: 3, kind: input, shape index: {}]   ;;  %s2332_s4 = inlined_call_operand.vmem [shape: f32[2,1,16], index: 4, kind: input, shape index: {}]   ;;  %s2333_s5 = inlined_call_operand.vmem [shape: bf16[2,16,16], index: 5, kind: input, shape index: {}]   ;;  %s2334_s6 = inlined_call_operand.vmem [shape: f32[2,1,16], index: 6, kind: input, shape index: {}]   ;;  %s2335_s7 = inlined_call_operand.hbm [shape: bf16[2,16,16], index: 7, kind: input, shape index: {}]   ;;  %s2336_s8 = inlined_call_operand.vmem [shape: f32[2,1,16], index: 8, kind: input, shape index: {}]   ;;  %s2337_s9 = inlined_call_operand.hbm [shape: bf16[2,8,32], index: 9, kind: output, shape index: {}]  }
   0x1   :  { %2363 = sst [smem:[#allocation28_spill]] %s2329_s1 }
   0x2   :  { %2364 = sst [smem:[#allocation29_spill]] %s2331_s3 }
   0x3   :  { %2365 = sst [smem:[#allocation30_spill]] %s2335_s7 }
   0x4   :  { %2366 = sst [smem:[#allocation31_spill]] %s2337_s9 }
   0x5   :  { %14 = vsyncpa [#allocation7], 0 }
   0x6   :  { %16 = vsyncpa [#allocation7 + $0x1], 0 }
   0x7   :  { %17 = vsyncpa [#allocation10], 0 }
   0x8   :  { %19 = vsyncpa [#allocation10 + $0x1], 0 }
   0x9   :  { %20 = vsyncpa [#allocation13], 0 }
   0xa   :  { %21 = vsyncpa [#allocation8], 0 }
   0xb   :  { %23 = vsyncpa [#allocation8 + $0x1], 0  ;;  %s1873_s30 = smov 0   ;;  %s1875_s10 = smov 0  }
   0xc   :  { %s1877_s11 = smov 0   ;;  %s1879_s12 = smov 0  }
   0xd   :  { %s1881_s13 = smov 0   ;;  %s1883_s14 = smov 0  }
   0xe LB: > { %2367 = sst [smem:[#allocation20_spill]] %s1788_s30  ;;  %s1904_s15 = sadd.s32 4294967295, %s1808_s14   ;;  %s1808_s14 = sphi %s1883_s14, %s29_s14   ;;  %s1804_s13 = sphi %s1881_s13, %s2411_s13   ;;  %s1800_s12 = sphi %s1879_s12, %s2410_s12   ;;  %s1796_s11 = sphi %s1877_s11, %s2414_s11   ;;  %s1792_s10 = sphi %s1875_s10, %s2413_s10   ;;  %s1788_s30 = sphi %s1873_s30, %s2412_s30  }
   0xf   : > { %2368 = sst [smem:[#allocation21_spill]] %s1800_s12  ;;  %s1320_s16 = sadd.s32 4294967294, %s1808_s14  }
  0x10   : > { %2369 = sst [smem:[#allocation22_spill]] %s1804_s13  ;;  %p64_p0 = scmp.ne.s32.totalorder %s1796_s11, %s1792_s10 }
  0x11   : > { %2370 = sst [smem:[#allocation23_spill]] %s1808_s14  ;;  %p65_p1 = scmp.eq.s32.totalorder %s1808_s14, 0 }
  0x12   : > { %p70_p2 = scmp.ne.s32.totalorder %s1792_s10, %s1788_s30  ;;  %p2340_p3 = scmp.eq.s32.totalorder %s1904_s15, 0 }
  0x13   : > { %p1913_p4 = por %p65_p1, %p64_p0  ;;  %p278_p5 = scmp.eq.s32.totalorder %s1904_s15, 1 }
  0x14   : > { %p1920_p6 = por %p2340_p3, %p70_p2  ;;  %p284_p7 = scmp.eq.s32.totalorder %s1320_s16, 1 }
  0x15   : > { %p1924_p8 = por %p278_p5, %p64_p0  ;;  %p1321_p9 = scmp.ge.s32.totalorder %s1808_s14, 1 }
  0x16   : > { %s2372_s18 = scalar_select %p1920_p6, 1, 0 }
  0x17   : > { %s2373_s19 = scalar_select %p1924_p8, 1, 0 }
  0x18   : > { %p1929_p10 = por %p284_p7, %p70_p2  ;;  %p291_p11 = scmp.lt.s32.totalorder %s1808_s14, 3 }
  0x19   : > { %2374 = sst [smem:[#allocation24_spill]] %s2373_s19  ;;  %s1810_s22 = smov [#allocation12]  }
  0x1a   : > { %s2375_s20 = scalar_select %p1929_p10, 1, 0 }
  0x1b   : > { %p1934_p12 = pnand %p1321_p9, %p291_p11  ;;  %s303_s23 = sshll.u32 %s1810_s22, 4  ;;  %s1938_s23 = int_to_ptr.vmem [resolvable:$true] %s303_s23 }
  0x1c   : > { %2376 = sst [smem:[#allocation25_spill]] %s2375_s20  ;;  %s48_s25 = sadd.s32 1, %s1804_s13 }
  0x1d   : > { %s2377_s21 = scalar_select %p1934_p12, 1, 0 }
  0x1e   : > { %p1468_p13 = pneg %p1934_p12  ;;  %p1951_p2 = scmp.ge.s32.totalorder %s48_s25, 2 }
  0x1f   : > { %s2380_s3 = sld [smem:[#allocation29_spill]] }
  0x20   : > { %p1945_p1 = pnand %p1468_p13, %p2340_p3 }
  0x22   : > { %s2378_s24 = scalar_select %p1945_p1, 1, 0 }
  0x23   : > { %p2354_p7 = pneg %p1945_p1 }
  0x25   : > { %s1572_s16 = scalar_lea.hbm %s2380_s3, 256 }
  0x26   : > { %p1573_p5 = scmp.ne.s32.totalorder %s2380_s3, %s1572_s16  ;;  %p1579_p13 = scmp.lt.u32.totalorder %s1572_s16, %s2380_s3 }
  0x28   : > { %p1575_p9 = pnand %p2354_p7, %p1573_p5 }
  0x2a   : > { %p1576_p11 = pneg %p1575_p9 }
  0x2c   : > { %p1581_p0 = pnand %p1579_p13, %p1576_p11 }
  0x2e   : > { %1584 = shalt.err (!%p1581_p0)
}
  0x2f   : > { %s1585_s28 = scalar_lea.vmem %s1938_s23, 256  ;;  %p1593_p6 = scmp.lt.s32.totalorder %s1938_s23, %s1938_s23 }
  0x30   : > { %p1586_p3 = scmp.ne.s32.totalorder %s1938_s23, %s1585_s28  ;;  %p1594_p5 = scmp.lt.s32.totalorder %s1585_s28, %s1585_s28 }
  0x32   : > { %p1588_p10 = pnand %p1586_p3, %p2354_p7  ;;  %p1595_p9 = por %p1594_p5, %p1593_p6 }
  0x34   : > { %p1589_p8 = pneg %p1588_p10 }
  0x36   : > { %p1596_p12 = pnand %p1595_p9, %p1589_p8 }
  0x38   : > { %1599 = shalt.err (!%p1596_p12)
}
  0x39   : > { %s2347_s30 = smov 64   ;;  %s2350_s20 = smov 4  }
  0x3a   : > { %1471 = dma.hbm_to_vmem [thread:$0]  (!%p1945_p1), %s2380_s3, 256, %s1938_s23, [#allocation13], %s2347_s30, %s2347_s30, %s2350_s20  }
  0x3b   : > { %s2416_s25 = smov (%p1951_p2, %s48_s25), 0  ;;  %p1491_p3 = scmp.lt.s32.totalorder %s1808_s14, 2 }
  0x3c   : > { %2381 = sst [smem:[#allocation26_spill]] %s2416_s25  ;;  %s2349_s16 = sand.u32 1, %s1796_s11  }
  0x3d   : > { %s52_s22 = ssub.s32 %s1804_s13, %s2416_s25  ;;  %s1995_s28 = sshll.u32 %s2349_s16, 3 }
  0x3e   : > { %p55_p6 = scmp.eq.s32.totalorder %s52_s22, 0  ;;  %s1998_s9 = sshll.u32 %s1804_s13, 7 }
  0x3f   : > { %p2002_p8 = pnand %p1491_p3, %p1913_p4  ;;  %s364_s23 = sand.u32 1, %s1808_s14  }
  0x40   : > { %s2383_s27 = sadd.s32 1, %s1796_s11  ;;  %s2385_s1 = sld [smem:[#allocation28_spill]] }
  0x41   : > { %s2382_s19 = scalar_select %p2002_p8, 1, 0 }
  0x42   : > { %s2010_s26 = scalar_select %p55_p6, %s1796_s11, %s2383_s27  }
  0x43   : > { %s368_s17 = scalar_lea.vmem [#allocation9], %s1995_s28  ;;  %s1813_s20 = smov [#allocation14]  }
  0x44   : > { %2384 = sst [smem:[#allocation27_spill]] %s2010_s26  ;;  %s376_s22 = sshll.u32 %s368_s17, 4  ;;  %s2019_s22 = int_to_ptr.vmem [resolvable:$true] %s376_s22 }
  0x45   : > { %s2021_s3 = sshll.u32 %s1813_s20, 4  ;;  %s2023_s25 = scalar_lea.sflag [#allocation10], %s364_s23  ;;  %s326_s3 = int_to_ptr.vmem [resolvable:$true] %s2021_s3 }
  0x46   : > { %s2016_s16 = scalar_lea.hbm %s2385_s1, %s1998_s9  ;;  %p2029_p10 = pneg %p2002_p8 }
  0x47   : > { %s1600_s27 = scalar_lea.hbm %s2016_s16, 128  ;;  %s1605_s13 = scalar_lea.hbm %s2385_s1, 256 }
  0x48   : > { %p1601_p4 = scmp.ne.s32.totalorder %s2016_s16, %s1600_s27  ;;  %p1606_p2 = scmp.lt.u32.totalorder %s2016_s16, %s2385_s1 }
  0x49   : > { %s2386_s30 = scalar_select %p2029_p10, 1, 0 }
  0x4a   : > { %p1603_p12 = pnand %p2029_p10, %p1601_p4  ;;  %p1607_p11 = scmp.lt.u32.totalorder %s1605_s13, %s1600_s27 }
  0x4b   : > { %p1609_p5 = scmp.lt.u32.totalorder %s1600_s27, %s2016_s16 }
  0x4c   : > { %p1604_p0 = pneg %p1603_p12  ;;  %p1608_p13 = por %p1607_p11, %p1606_p2 }
  0x4e   : > { %p1610_p9 = por %p1609_p5, %p1608_p13 }
  0x50   : > { %p1611_p3 = pnand %p1610_p9, %p1604_p0 }
  0x52   : > { %1614 = shalt.err (!%p1611_p3)
}
  0x53   : > { %s1615_s23 = scalar_lea.vmem %s2019_s22, 128  ;;  %s1814_s29 = smov [#allocation9]  }
  0x54   : > { %p1616_p6 = scmp.ne.s32.totalorder %s2019_s22, %s1615_s23  ;;  %s1620_s17 = sshll.u32 %s1814_s29, 4  ;;  %s1621_s17 = int_to_ptr.vmem [resolvable:$false] %s1620_s17 }
  0x55   : > { %s1622_s26 = scalar_lea.vmem %s1621_s17, 256  ;;  %p1623_p7 = scmp.lt.s32.totalorder %s2019_s22, %s1621_s17 }
  0x56   : > { %p1618_p4 = pnand %p1616_p6, %p2029_p10  ;;  %p1624_p1 = scmp.lt.s32.totalorder %s1622_s26, %s1615_s23 }
  0x58   : > { %p1619_p12 = pneg %p1618_p4  ;;  %p1625_p2 = por %p1624_p1, %p1623_p7 }
  0x5a   : > { %p1626_p11 = pnand %p1625_p2, %p1619_p12 }
  0x5c   : > { %1629 = shalt.err (!%p1626_p11)
}
  0x5d   : > { %s2387_s13 = smov 4   ;;  %s2388_s27 = smov 64  }
  0x5e   : > { %1481 = dma.hbm_to_vmem [thread:$0]  (!%p2002_p8), %s2016_s16, 128, %s2019_s22, %s2023_s25, %s2388_s27, %s2388_s27, %s2387_s13  }
  0x5f   : > { %s2389_s7 = sld [smem:[#allocation30_spill]]  ;;  %p2390_p7 = scmp.ne.s32.totalorder %s2378_s24, 0 }
  0x61   : > { %p2391_p0 = pneg %p2390_p7 }
  0x65   : > { %s1630_s17 = scalar_lea.hbm %s2389_s7, 256 }
  0x66   : > { %p1631_p1 = scmp.ne.s32.totalorder %s2389_s7, %s1630_s17  ;;  %p1637_p9 = scmp.lt.u32.totalorder %s1630_s17, %s2389_s7 }
  0x68   : > { %p1633_p13 = pnand %p1631_p1, %p2391_p0 }
  0x6a   : > { %p1634_p5 = pneg %p1633_p13 }
  0x6c   : > { %p1639_p3 = pnand %p1637_p9, %p1634_p5 }
  0x6e   : > { %1642 = shalt.err (!%p1639_p3)
}
  0x6f   : > { %s1643_s16 = scalar_lea.vmem %s326_s3, 256  ;;  %p2392_p4 = pmov %p2391_p0 }
  0x70   : > { %p1644_p6 = scmp.ne.s32.totalorder %s326_s3, %s1643_s16  ;;  %p1651_p11 = scmp.lt.s32.totalorder %s326_s3, %s326_s3 }
  0x71   : > { %p1652_p8 = scmp.lt.s32.totalorder %s1643_s16, %s1643_s16 }
  0x72   : > { %p1646_p12 = pnand %p1644_p6, %p2392_p4 }
  0x73   : > { %p1653_p10 = por %p1652_p8, %p1651_p11 }
  0x74   : > { %p1647_p2 = pneg %p1646_p12 }
  0x76   : > { %p1654_p0 = pnand %p1653_p10, %p1647_p2 }
  0x78   : > { %1657 = shalt.err (!%p1654_p0)
}
  0x79   : > { %1474 = dma.hbm_to_vmem [thread:$0]  (!%p2390_p7), %s2389_s7, 256, %s326_s3, [#allocation13], %s2388_s27, %s2388_s27, %s2387_s13  }
  0x7a   : > { %s2084_s29 = scalar_lea.hbm %s2328_s0, %s1998_s9  ;;  %s346_s24 = scalar_lea.vmem [#allocation6], %s1995_s28 }
  0x7b   : > { %s354_s17 = sshll.u32 %s346_s24, 4  ;;  %s2093_s16 = scalar_lea.hbm %s2330_s2, %s1998_s9  ;;  %s2087_s17 = int_to_ptr.vmem [resolvable:$true] %s354_s17 }
  0x7c   : > { %s2393_s1 = sand.u32 1, %s1796_s11   ;;  %s1658_s14 = scalar_lea.hbm %s2084_s29, 128 }
  0x7d   : > { %s2097_s3 = scalar_lea.sflag [#allocation7], %s2393_s1  ;;  %p1659_p8 = scmp.ne.s32.totalorder %s2084_s29, %s1658_s14 }
  0x7e   : > { %p2394_p10 = scmp.ne.s32.totalorder %s2386_s30, 0  ;;  %s1663_s7 = scalar_lea.hbm %s2328_s0, 256 }
  0x7f   : > { %p1664_p13 = scmp.lt.u32.totalorder %s2084_s29, %s2328_s0  ;;  %p1665_p5 = scmp.lt.u32.totalorder %s1663_s7, %s1658_s14 }
  0x80   : > { %p1661_p1 = pnand %p1659_p8, %p2394_p10  ;;  %p1667_p3 = scmp.lt.u32.totalorder %s1658_s14, %s2084_s29 }
  0x81   : > { %p1666_p9 = por %p1665_p5, %p1664_p13 }
  0x82   : > { %p1662_p7 = pneg %p1661_p1 }
  0x83   : > { %p1668_p6 = por %p1667_p3, %p1666_p9 }
  0x85   : > { %p1669_p4 = pnand %p1668_p6, %p1662_p7 }
  0x87   : > { %1672 = shalt.err (!%p1669_p4)
}
  0x88   : > { %s1673_s9 = scalar_lea.vmem %s2087_s17, 128  ;;  %s1815_s23 = smov [#allocation6]  }
  0x89   : > { %p1674_p12 = scmp.ne.s32.totalorder %s2087_s17, %s1673_s9  ;;  %s1678_s26 = sshll.u32 %s1815_s23, 4  ;;  %s1679_s26 = int_to_ptr.vmem [resolvable:$false] %s1678_s26 }
  0x8a   : > { %s1680_s12 = scalar_lea.vmem %s1679_s26, 256  ;;  %p1681_p0 = scmp.lt.s32.totalorder %s2087_s17, %s1679_s26 }
  0x8b   : > { %p1676_p2 = pnand %p1674_p12, %p2394_p10  ;;  %p1682_p8 = scmp.lt.s32.totalorder %s1680_s12, %s1673_s9 }
  0x8d   : > { %p1677_p11 = pneg %p1676_p2  ;;  %p1683_p1 = por %p1682_p8, %p1681_p0 }
  0x8f   : > { %p1684_p13 = pnand %p1683_p1, %p1677_p11 }
  0x91   : > { %1687 = shalt.err (!%p1684_p13)
}
  0x92   : > { %p2395_p7 = scmp.ne.s32.totalorder %s2382_s19, 0  ;;  %s390_s7 = scalar_lea.vmem [#allocation11], %s1995_s28 }
  0x93   : > { %s398_s1 = sshll.u32 %s390_s7, 4  ;;  %s1688_s14 = scalar_lea.hbm %s2093_s16, 128  ;;  %s2125_s1 = int_to_ptr.vmem [resolvable:$true] %s398_s1 }
  0x94   : > { %1478 = dma.hbm_to_vmem [thread:$0]  (!%p2395_p7), %s2084_s29, 128, %s2087_s17, %s2097_s3, %s2388_s27, %s2388_s27, %s2387_s13  }
  0x95   : > { %p1689_p5 = scmp.ne.s32.totalorder %s2093_s16, %s1688_s14  ;;  %s1693_s24 = scalar_lea.hbm %s2330_s2, 256 }
  0x96   : > { %p1694_p6 = scmp.lt.u32.totalorder %s2093_s16, %s2330_s2  ;;  %p1695_p4 = scmp.lt.u32.totalorder %s1693_s24, %s1688_s14 }
  0x97   : > { %p1691_p9 = pnand %p1689_p5, %p2394_p10  ;;  %p1697_p2 = scmp.lt.u32.totalorder %s1688_s14, %s2093_s16 }
  0x98   : > { %p1696_p12 = por %p1695_p4, %p1694_p6 }
  0x99   : > { %p1692_p3 = pneg %p1691_p9 }
  0x9a   : > { %p1698_p11 = por %p1697_p2, %p1696_p12 }
  0x9c   : > { %p1699_p0 = pnand %p1698_p11, %p1692_p3 }
  0x9e   : > { %1702 = shalt.err (!%p1699_p0)
}
  0x9f   : > { %s1703_s28 = scalar_lea.vmem %s2125_s1, 128  ;;  %s1816_s29 = smov [#allocation11]  }
  0xa0   : > { %p1704_p8 = scmp.ne.s32.totalorder %s2125_s1, %s1703_s28  ;;  %s1708_s17 = sshll.u32 %s1816_s29, 4  ;;  %s1709_s17 = int_to_ptr.vmem [resolvable:$false] %s1708_s17 }
  0xa1   : > { %s1710_s3 = scalar_lea.vmem %s1709_s17, 256  ;;  %p1711_p5 = scmp.lt.s32.totalorder %s2125_s1, %s1709_s17 }
  0xa2   : > { %p1706_p1 = pnand %p1704_p8, %p2394_p10  ;;  %p1712_p9 = scmp.lt.s32.totalorder %s1710_s3, %s1703_s28 }
  0xa4   : > { %p1707_p13 = pneg %p1706_p1  ;;  %p1713_p6 = por %p1712_p9, %p1711_p5 }
  0xa6   : > { %p1714_p4 = pnand %p1713_p6, %p1707_p13 }
  0xa8   : > { %1717 = shalt.err (!%p1714_p4)
}
  0xa9   : > { %1484 = dma.hbm_to_vmem [thread:$0]  (!%p2395_p7), %s2093_s16, 128, %s2125_s1, %s2023_s25, %s2388_s27, %s2388_s27, %s2387_s13  }
  0xaa   : > { %p2396_p10 = scmp.ne.s32.totalorder %s2377_s21, 0 }
  0xab   : > { %s2155_s30 = sand.u32 (!%p2396_p10), 1, %s1792_s10   ;;  %p2397_p3 = scmp.ne.s32.totalorder (!%p2396_p10), %s2372_s18, 0 }
  0xac   : > { %410 = sbr.rel (%p2396_p10) target bundleno = 1349 (0x545), region = 56  ;;  %s2158_s26 = sshll.u32 (!%p2396_p10), %s2155_s30, 3 }
  0xad   : > { %s413_s19 = scalar_lea.sflag (!%p2396_p10), [#allocation7], %s2155_s30  ;;  %s416_s12 = scalar_lea.vmem (!%p2396_p10), [#allocation6], %s2158_s26 }
  0xb3   : > { %1771 = dma.done.wait (%p2397_p3), %s413_s19, 128  }
  0xb4   : > { %1773 = vsyncadd (%p2397_p3), %s413_s19, 4294967168  ;;  %s421_s21 = sand.u32 1, %s1904_s15   ;;  %s425_s13 = scalar_lea.vmem [#allocation9], %s2158_s26 }
  0xb5   : > { %s422_s25 = scalar_lea.sflag [#allocation10], %s421_s21 }
  0xb6   : > { %1775 = dma.done.wait (%p2397_p3), %s422_s25, 256  }
  0xb7   : > { %1777 = vsyncadd (%p2397_p3), %s422_s25, 4294967040  ;;  %s434_s27 = scalar_lea.vmem [#allocation11], %s2158_s26  ;;  %p2398_p7 = scmp.eq.s32.totalorder %s1904_s15, 0 }
  0xb9   : > { %1779 = dma.done.wait (%p2398_p7), [#allocation13], 512   ;;  %p2399_p12 = pmov %p2398_p7 }
  0xba   : > { %vm518_vm0 = vcmask 130048   ;;  %v1817_v0 = vmov 0.0   ;;  %vm1818_vm1 = vmmov 0   ;;  %v1554_v1 = vld [vmem:[#allocation12 + $0x8] sm:$0xff]   ;;  %v493_v2 = vld [vmem:[%s416_s12 + $0x4] sm:$0xf] }
  0xbb   : > { %1781 = vsyncadd (%p2399_p12), [#allocation13], 4294966784  ;;  %1398 = vmatprep.subr.bf16.mxu1 %v1817_v0  ;;  %1400 = vmatprep.mubr.msk.bf16.mxu1 %vm1818_vm1, %v1817_v0  ;;  %621 = vst.msk [vmem:[#allocation5] sm:$0xff] %vm518_vm0, %v1817_v0  ;;  %v1555_v3 = vld [vmem:[#allocation12] sm:$0xff]   ;;  %v492_v5 = vld [vmem:[%s416_s12] sm:$0xf] }
  0xbc   : > { %622 = vst.msk [vmem:[#allocation5 + $0x8] sm:$0xff] %vm518_vm0, %v1817_v0  ;;  %1392 = vmatprep.subr.bf16.mxu0 %v1817_v0  ;;  %1394 = vmatprep.mubr.msk.bf16.mxu0 %vm1818_vm1, %v1817_v0  ;;  %v1556_v4 = vld [vmem:[%s2333_s5 + $0x8] sm:$0xff]   ;;  %v1557_v6 = vld [vmem:[%s2333_s5] sm:$0xff]   ;;  %v1559_v10 = vld [vmem:[#allocation14] sm:$0xff]   ;;  %vm613_vm2 = vcmask 125952   ;;  %vm1025_vm3 = vcmask 1043456  }
  0xbd   : > { %1399 = vmatpush3.bf16.msra.mxu1 %v1554_v1  ;;  %1393 = vmatpush3.bf16.msra.mxu0 %v1555_v3  ;;  %v624_v7 = vld [vmem:[%s425_s13 + $0x4] sm:$0xf]  ;;  %v623_v8 = vld [vmem:[%s425_s13] sm:$0xf]  ;;  %v1558_v9 = vld [vmem:[#allocation14 + $0x8] sm:$0xff]   ;;  %vm616_vm4 = vcmask 7168  }
  0xbe   : > { %1410 = vmatprep.subr.bf16.mxu1 %v1817_v0  ;;  %1404 = vmatprep.subr.bf16.mxu0 %v1817_v0  ;;  %v745_v11 = vld [vmem:[%s434_s27 + $0x4] sm:$0xf]  ;;  %v744_v12 = vld [vmem:[%s434_s27] sm:$0xf]  ;;  %v1819_v61 = vmov -inf   ;;  %619 = vst.msk [vmem:[#allocation4] sm:$0xff] %vm616_vm4, %v1817_v0 }
  0xbf   : > { %v1342_v13 = vld [vmem:[%s2332_s4 + $0x1] ss:$0 sm:$0xff]  ;;  %v1341_v15 = vld [vmem:[%s2332_s4] ss:$0 sm:$0xff]  ;;  %618 = vst.msk [vmem:[#allocation3 + $0x8] sm:$0xff] %vm616_vm4, %v1819_v61  ;;  %617 = vst.msk [vmem:[#allocation3] sm:$0xff] %vm616_vm4, %v1819_v61 }
  0xc0   : > { %1401 = vmatmul.mubr.msk.bf16.vlgmr.msra.gmra.mrb[0].mxu1 %vm518_vm0, %v493_v2  ;;  %1395 = vmatmul.mubr.msk.bf16.vlgmr.msra.gmra.mrb[0].mxu0 %vm518_vm0, %v492_v5  ;;  %v1348_v27 = vld [vmem:[%s2334_s6 + $0x1] ss:$0 sm:$0xff]  ;;  %v1347_v29 = vld [vmem:[%s2334_s6] ss:$0 sm:$0xff]  ;;  %620 = vst.msk [vmem:[#allocation4 + $0x8] sm:$0xff] %vm616_vm4, %v1817_v0  ;;  %vm960_vm5 = vcmask 64512  }
  0xc1   : > { %1411 = vmatpush3.bf16.msra.mxu1 %v1556_v4  ;;  %1412 = vmatprep.mubr.msk.bf16.mxu1 %vm1818_vm1, %v1817_v0  ;;  %v1354_v45 = vld [vmem:[%s2336_s8 + $0x1] ss:$0 sm:$0xff]  ;;  %v1353_v52 = vld [vmem:[%s2336_s8] ss:$0 sm:$0xff]  ;;  %s2400_s19 = sld [smem:[#allocation21_spill]]  ;;  %s1340_s12 = sshll.u32 %s2155_s30, 2 }
  0xc2   : > { %1422 = vmatprep.subr.bf16.mxu1 %v1817_v0  ;;  %1405 = vmatpush3.bf16.msra.mxu0 %v1557_v6  ;;  %s2401_s21 = sld [smem:[#allocation24_spill]]  ;;  %s1821_s25 = smov 16   ;;  %vm1152_vm6 = vcmask 257152  }
  0xc3   : > { %1406 = vmatprep.mubr.msk.bf16.mxu0 %vm1818_vm1, %v1817_v0  ;;  %1416 = vmatprep.subr.bf16.mxu0 %v1817_v0  ;;  %s486_s13 = scalar_lea.vmem [#allocation15], %s1340_s12  ;;  %s2402_s7 = sld [smem:[#allocation31_spill]] }
  0xc4   : > { %s1169_s15 = sshll.u32 %s486_s13, 4  ;;  %s1155_s14 = scalar_lea.sflag [#allocation8], %s2155_s30  ;;  %s2281_s15 = int_to_ptr.vmem [resolvable:$true] %s1169_s15 }
  0xc5   : > { %s1718_s22 = scalar_lea.vmem %s2281_s15, 64  ;;  %s1822_s20 = smov [#allocation15]  }
  0xc6   : > { %p1719_p2 = scmp.ne.s32.totalorder %s2281_s15, %s1718_s22  ;;  %s1722_s24 = sshll.u32 %s1822_s20, 4  ;;  %s1723_s24 = int_to_ptr.vmem [resolvable:$false] %s1722_s24 }
  0xc7   : > { %s1365_s27 = sshll.u32 %s2400_s19, 6  ;;  %s1724_s9 = scalar_lea.vmem %s1723_s24, 128 }
  0xc8   : > { %1413 = vmatmul.mubr.msk.bf16.vlgmr.msra.gmra.mrb[4].mxu1 %vm518_vm0, %v624_v7  ;;  %1407 = vmatmul.mubr.msk.bf16.vlgmr.msra.gmra.mrb[4].mxu0 %vm518_vm0, %v623_v8  ;;  %p2403_p11 = scmp.ne.s32.totalorder %s2401_s21, 0  ;;  %p1725_p1 = scmp.lt.s32.totalorder %s2281_s15, %s1723_s24 }
  0xc9   : > { %1424 = vmatprep.mubr.msk.bf16.mxu1 %vm1818_vm1, %v1817_v0  ;;  %1418 = vmatprep.mubr.msk.bf16.mxu0 %vm1818_vm1, %v1817_v0  ;;  %s2279_s1 = scalar_lea.hbm %s2402_s7, %s1365_s27  ;;  %p1726_p13 = scmp.lt.s32.totalorder %s1724_s9, %s1718_s22 }
  0xca   : > { %1423 = vmatpush3.bf16.msra.mxu1 %v1558_v9  ;;  %1417 = vmatpush3.bf16.msra.mxu0 %v1559_v10  ;;  %v1820_v9 = vmov 0   ;;  %v959_v10 = vld [vmem:[#allocation3 + $0x8] sm:$0xff]  ;;  %p1720_p0 = pnand %p1719_p2, %p2403_p11 }
  0xcb   : > { %1434 = vmatprep.subr.bf16.mxu1 %v1817_v0  ;;  %1428 = vmatprep.subr.bf16.mxu0 %v1817_v0  ;;  %p1727_p5 = por %p1726_p13, %p1725_p1 }
  0xcc   : > { %1552 = vset.pattern.permute.xlu1 %v1820_v9  ;;  %1553 = vset.pattern.permute.xlu0 %v1820_v9  ;;  %p1721_p8 = pneg %p1720_p0 }
  0xce   : > { %p1728_p9 = pnand %p1727_p5, %p1721_p8 }
  0xd0   : > { %1425 = vmatmul.mubr.msk.bf16.vlgmr.msra.gmra.mrb[8].mxu1 %vm518_vm0, %v745_v11  ;;  %1419 = vmatmul.mubr.msk.bf16.vlgmr.msra.gmra.mrb[8].mxu0 %vm518_vm0, %v744_v12  ;;  %v958_v12 = vld [vmem:[#allocation3] sm:$0xff] }
  0xd1   : > { %1436 = vmatprep.mubr.msk.bf16.mxu1 %vm1818_vm1, %v1817_v0  ;;  %1430 = vmatprep.mubr.msk.bf16.mxu0 %vm1818_vm1, %v1817_v0 }
 0x193   : > { %v605_v14 = vpop.f32.mrb[0].mxu1  ;;  %v556_v19 = vpop.f32.mrb[0].mxu0 }
 0x194   : > { %v606_v16 = vadd.f32 %v1342_v13, %v605_v14  ;;  %v1402_v17 = vpop.f32.mrb[1].mxu1  ;;  %v557_v22 = vadd.f32 %v1341_v15, %v556_v19  ;;  %v1396_v23 = vpop.f32.mrb[1].mxu0 }
 0x195   : > { %v608_v18 = vpop.f32.mrb[2].mxu1  ;;  %v559_v24 = vpop.f32.mrb[2].mxu0 }
 0x196   : > { %v612_v20 = vpack.c.bf16 %v606_v16, %v606_v16  ;;  %v1403_v21 = vpop.f32.mrb[3].mxu1  ;;  %v611_v25 = vpack.c.bf16 %v557_v22, %v557_v22  ;;  %v1397_v26 = vpop.f32.mrb[3].mxu0 }
 0x198   : > { %615 = vst.msk [vmem:[#allocation2 + $0x4] sm:$0xf] %vm613_vm2, %v612_v20  ;;  %614 = vst.msk [vmem:[#allocation2] sm:$0xf] %vm613_vm2, %v611_v25 }
 0x19b   : > { %v736_v28 = vpop.f32.mrb[4].mxu1  ;;  %v687_v33 = vpop.f32.mrb[4].mxu0 }
 0x19c   : > { %v737_v30 = vadd.f32 %v1348_v27, %v736_v28  ;;  %v1414_v31 = vpop.f32.mrb[5].mxu1  ;;  %v688_v36 = vadd.f32 %v1347_v29, %v687_v33  ;;  %v1408_v37 = vpop.f32.mrb[5].mxu0  ;;  %v992_v33 = vld [vmem:[#allocation4 + $0x8] sm:$0xff] }
 0x19d   : > { %v739_v32 = vpop.f32.mrb[6].mxu1  ;;  %v690_v38 = vpop.f32.mrb[6].mxu0 }
 0x19e   : > { %v743_v34 = vpack.c.bf16 %v737_v30, %v737_v30  ;;  %v1415_v35 = vpop.f32.mrb[7].mxu1  ;;  %v742_v40 = vpack.c.bf16 %v688_v36, %v688_v36  ;;  %v1409_v41 = vpop.f32.mrb[7].mxu0  ;;  %v991_v36 = vld [vmem:[#allocation4] sm:$0xff] }
 0x19f   : > { %v865_v43 = vld [vmem:[#allocation2 + $0x4] sm:$0xf]  ;;  %v864_v44 = vld [vmem:[#allocation2] sm:$0xf] }
 0x1a0   : > { %v916_v39 = vsel %vm518_vm0, %v743_v34, 0  ;;  %v870_v42 = vsel %vm518_vm0, %v742_v40, 0 }
 0x1a1   : > { %1435 = vmatpush3.bf16.xpose.msra.mxu1 %v916_v39  ;;  %1429 = vmatpush3.bf16.xpose.msra.mxu0 %v870_v42 }
 0x1a2   : > { %1446 = vmatprep.subr.bf16.mxu1 %v1817_v0  ;;  %1440 = vmatprep.subr.bf16.mxu0 %v1817_v0 }
 0x1a3   : > { %v856_v46 = vpop.f32.mrb[8].mxu1  ;;  %v807_v54 = vpop.f32.mrb[8].mxu0 }
 0x1a4   : > { %v857_v47 = vadd.f32 %v1354_v45, %v856_v46  ;;  %v1426_v48 = vpop.f32.mrb[9].mxu1  ;;  %v808_v55 = vadd.f32 %v1353_v52, %v807_v54  ;;  %v1420_v56 = vpop.f32.mrb[9].mxu0  ;;  %v1007_v46 = vld [vmem:[#allocation5 + $0x8] sm:$0xff] }
 0x1a5   : > { %v859_v49 = vpop.f32.mrb[10].mxu1  ;;  %v810_v57 = vpop.f32.mrb[10].mxu0  ;;  %v1006_v48 = vld [vmem:[#allocation5] sm:$0xff] }
 0x1a6   : > { %v863_v50 = vpack.c.bf16 %v857_v47, %v857_v47  ;;  %v1427_v51 = vpop.f32.mrb[11].mxu1  ;;  %v862_v58 = vpack.c.bf16 %v808_v55, %v808_v55  ;;  %v1421_v59 = vpop.f32.mrb[11].mxu0 }
 0x1a8   : > { %1437 = vmatmul.mubr.msk.bf16.vlgmr.msra.gmra.mrb[12].mxu1 %vm518_vm0, %v865_v43  ;;  %1431 = vmatmul.mubr.msk.bf16.vlgmr.msra.gmra.mrb[12].mxu0 %vm518_vm0, %v864_v44  ;;  %v1073_v53 = vsel %vm1025_vm3, %v863_v50, 0  ;;  %v1027_v60 = vsel %vm1025_vm3, %v862_v58, 0 }
 0x1a9   : > { %1448 = vmatprep.mubr.msk.bf16.mxu1 %vm1818_vm1, %v1817_v0  ;;  %1442 = vmatprep.mubr.msk.bf16.mxu0 %vm1818_vm1, %v1817_v0 }
 0x1aa   : > { %1447 = vmatpush3.bf16.msra.mxu1 %v1073_v53  ;;  %1441 = vmatpush3.bf16.msra.mxu0 %v1027_v60 }
 0x27b   : > { %v952_v62 = vpop.f32.mrb[12].mxu1  ;;  %v906_v3 = vpop.f32.mrb[12].mxu0 }
 0x27c   : > { %v1438_v63 = vpop.f32.mrb[13].mxu1  ;;  %v964_v1 = vsel %vm960_vm5, %v952_v62, -inf  ;;  %v961_v5 = vsel %vm960_vm5, %v906_v3, -inf  ;;  %v1432_v6 = vpop.f32.mrb[13].mxu0 }
 0x27d   : > { %965 = vmax.xlane.f32.xlu0 %v964_v1  ;;  %v955_v2 = vpop.f32.mrb[14].mxu1  ;;  %v909_v7 = vpop.f32.mrb[14].mxu0 }
 0x27e   : > { %v1439_v4 = vpop.f32.mrb[15].mxu1  ;;  %v1433_v8 = vpop.f32.mrb[15].mxu0 }
 0x281   : > { %962 = vmax.xlane.f32.xlu0 %v961_v5 }
 0x30a   : > { %v966_v0 = vpop.xlane.xlu0 %965 }
 0x30b   : > { %v968_v11 = vmax.f32 %v959_v10, %v966_v0 }
 0x30d   : > { %v970_v13 = vsub.f32 %v959_v10, %v968_v11  ;;  %1120 = vst.msk [vmem:[#allocation3 + $0x8] sm:$0xff] %vm616_vm4, %v968_v11  ;;  %982 = vperm.xlu1 %1552, %v968_v11  }
 0x30e   : > { %v963_v14 = vpop.xlane.xlu0 %962 }
 0x30f   : > { %v967_v15 = vmax.f32 %v958_v12, %v963_v14  ;;  %v973_v29 = vmul.f32 1.442695, %v970_v13 }
 0x311   : > { %v969_v16 = vsub.f32 %v958_v12, %v967_v15  ;;  %1119 = vst.msk [vmem:[#allocation3] sm:$0xff] %vm616_vm4, %v967_v15  ;;  %977 = vperm.xlu1 %1552, %v967_v15  }
 0x313   : > { %v971_v30 = vmul.f32 1.442695, %v969_v16 }
 0x38c   : > { %v983_v17 = vpop.permute.xlu1 %982 }
 0x38d   : > { %v986_v18 = vsub.f32 %v952_v62, %v983_v17 }
 0x38f   : > { %v989_v19 = vmul.f32 1.442695, %v986_v18 }
 0x390   : > { %v978_v20 = vpop.permute.xlu1 %977 }
 0x391   : > { %1560 = vpow2.f32 %v989_v19  ;;  %v985_v21 = vsub.f32 %v906_v3, %v978_v20 }
 0x393   : > { %v987_v22 = vmul.f32 1.442695, %v985_v21 }
 0x395   : > { %1562 = vpow2.f32 %v987_v22 }
 0x396   : > { %1564 = vpow2.f32 %v973_v29 }
 0x397   : > { %1566 = vpow2.f32 %v971_v30 }
 0x39b   : > { %v1561_v23 = vpop.eup %1560 }
 0x39c   : > { %v998_v24 = vsel %vm960_vm5, %v1561_v23, 0.0  ;;  %v1021_v25 = vpack.c.bf16 %v1561_v23, %v1561_v23 }
 0x39d   : > { %999 = vadd.xlane.f32.xlu0 %v998_v24 }
 0x39e   : > { %1449 = vmatmul.mubr.msk.bf16.vlgmr.msra.gmra.mrb[16].mxu1 %vm960_vm5, %v1021_v25 }
 0x39f   : > { %v1563_v26 = vpop.eup %1562 }
 0x3a0   : > { %v995_v27 = vsel %vm960_vm5, %v1563_v26, 0.0  ;;  %v1020_v28 = vpack.c.bf16 %v1563_v26, %v1563_v26  ;;  %v1565_v31 = vpop.eup %1564 }
 0x3a1   : > { %996 = vadd.xlane.f32.xlu1 %v995_v27  ;;  %v1567_v32 = vpop.eup %1566  ;;  %v994_v34 = vmul.f32 %v1565_v31, %v992_v33 }
 0x3a2   : > { %1443 = vmatmul.mubr.msk.bf16.vlgmr.msra.gmra.mrb[16].mxu0 %vm960_vm5, %v1020_v28  ;;  %v993_v38 = vmul.f32 %v1567_v32, %v991_v36 }
 0x3b3   : > { %1015 = vperm.xlu0 %1553, %v1565_v31  }
 0x3b7   : > { %1010 = vperm.xlu0 %1553, %v1567_v32  }
 0x42a   : > { %v1000_v35 = vpop.xlane.xlu0 %999 }
 0x42b   : > { %v1002_v37 = vadd.f32 %v1000_v35, %v994_v34 }
 0x42d   : > { %1005 = vst.msk [vmem:[#allocation4 + $0x8] sm:$0xff] %vm616_vm4, %v1002_v37 }
 0x42e   : > { %v997_v39 = vpop.xlane.xlu1 %996 }
 0x42f   : > { %v1001_v40 = vadd.f32 %v997_v39, %v993_v38 }
 0x431   : > { %1004 = vst.msk [vmem:[#allocation4] sm:$0xff] %vm616_vm4, %v1001_v40 }
 0x432   : > { %v1016_v45 = vpop.permute.xlu0 %1015 }
 0x433   : > { %v1019_v47 = vmul.f32 %v1016_v45, %v1007_v46 }
 0x434   : > { %v1127_v41 = vld [vmem:[#allocation4 + $0x8] sm:$0xff] }
 0x435   : > { %1568 = vrcp.f32 %v1127_v41 }
 0x436   : > { %v1011_v49 = vpop.permute.xlu0 %1010 }
 0x437   : > { %v1018_v54 = vmul.f32 %v1011_v49, %v1006_v48 }
 0x438   : > { %v1126_v42 = vld [vmem:[#allocation4] sm:$0xff] }
 0x439   : > { %1570 = vrcp.f32 %v1126_v42 }
 0x43f   : > { %v1569_v43 = vpop.eup %1568 }
 0x440   : > { %1137 = vperm.xlu1 %1552, %v1569_v43  }
 0x443   : > { %v1571_v44 = vpop.eup %1570 }
 0x444   : > { %1132 = vperm.xlu0 %1553, %v1571_v44  }
 0x471   : > { %v1109_v50 = vpop.f32.mrb[16].mxu1 }
 0x472   : > { %v1116_v51 = vadd.f32 %v1109_v50, %v1019_v47  ;;  %v1450_v52 = vpop.f32.mrb[17].mxu1 }
 0x473   : > { %v1112_v53 = vpop.f32.mrb[18].mxu1 }
 0x474   : > { %1118 = vst.msk [vmem:[#allocation5 + $0x8] sm:$0xff] %vm518_vm0, %v1116_v51  ;;  %v1451_v55 = vpop.f32.mrb[19].mxu1 }
 0x475   : > { %v1063_v56 = vpop.f32.mrb[16].mxu0 }
 0x476   : > { %v1115_v57 = vadd.f32 %v1063_v56, %v1018_v54  ;;  %v1444_v58 = vpop.f32.mrb[17].mxu0 }
 0x477   : > { %v1066_v59 = vpop.f32.mrb[18].mxu0 }
 0x478   : > { %1117 = vst.msk [vmem:[#allocation5] sm:$0xff] %vm518_vm0, %v1115_v57  ;;  %v1445_v60 = vpop.f32.mrb[19].mxu0 }
 0x47b   : > { %v1125_v62 = vld [vmem:[#allocation5 + $0x8] sm:$0xff] }
 0x47f   : > { %v1124_v3 = vld [vmem:[#allocation5] sm:$0xff] }
 0x4bf   : > { %v1138_v61 = vpop.permute.xlu1 %1137 }
 0x4c0   : > { %v1141_v63 = vmul.f32 %v1138_v61, %v1125_v62 }
 0x4c2   : > { %v1371_v1 = vpack.c.bf16 %v1141_v63, %v1141_v63 }
 0x4c3   : > { %v1133_v2 = vpop.permute.xlu0 %1132 }
 0x4c4   : > { %v1140_v4 = vmul.f32 %v1133_v2, %v1124_v3  ;;  %1149 = vrot.lane.b32.xlu1 %v1371_v1, %s1821_s25 }
 0x4c6   : > { %v1142_v5 = vpack.c.bf16 %v1140_v4, %v1140_v4 }
 0x4c8   : > { %1144 = vst.msk [vmem:[%s486_s13] sm:$0xf] %vm613_vm2, %v1142_v5 }
 0x536   : > { %v1150_v6 = vpop.permute.xlu1 %1149 }
 0x537   : > { %1153 = vst.msk [vmem:[%s486_s13] sm:$0xf] %vm1152_vm6, %v1150_v6 }
 0x538   : > { %1731 = shalt.err (!%p1728_p9)
}
 0x539   : > { %s1732_s30 = scalar_lea.hbm %s2279_s1, 64  ;;  %s1736_s29 = scalar_lea.hbm %s2402_s7, 128 }
 0x53a   : > { %p1733_p6 = scmp.ne.s32.totalorder %s2279_s1, %s1732_s30  ;;  %p1737_p3 = scmp.lt.u32.totalorder %s2279_s1, %s2402_s7 }
 0x53b   : > { %p1738_p7 = scmp.lt.u32.totalorder %s1736_s29, %s1732_s30  ;;  %p1740_p2 = scmp.lt.u32.totalorder %s1732_s30, %s2279_s1 }
 0x53c   : > { %p1734_p4 = pnand %p1733_p6, %p2403_p11 }
 0x53d   : > { %p1739_p12 = por %p1738_p7, %p1737_p3 }
 0x53e   : > { %p1735_p10 = pneg %p1734_p4 }
 0x53f   : > { %p1741_p0 = por %p1740_p2, %p1739_p12 }
 0x541   : > { %p1742_p8 = pnand %p1741_p0, %p1735_p10 }
 0x543   : > { %1745 = shalt.err (!%p1742_p8)
}
 0x544   : > { %1466 = dma.vmem_to_hbm [thread:$0]  (%p2403_p11), %s2281_s15, 64, %s2279_s1, %s1155_s14  }
 0x545 PF: > { %s2404_s26 = sld [smem:[#allocation20_spill]]  ;;  %s2405_s19 = sld [smem:[#allocation25_spill]] }
 0x546   : > { %s2406_s12 = sld [smem:[#allocation23_spill]] }
 0x54b   : > { %s1181_s25 = sand.u32 1, %s2404_s26   ;;  %p2407_p1 = scmp.ne.s32.totalorder %s2405_s19, 0 }
 0x54c   : > { %p2408_p13 = scmp.ge.s32.totalorder %s2406_s12, 2  ;;  %s1182_s13 = scalar_lea.sflag [#allocation8], %s1181_s25 }
 0x54e   : > { %p1486_p5 = pnand %p2408_p13, %p2407_p1 }
 0x550   : > { %1783 = dma.done.wait (!%p1486_p5), %s1182_s13, 64  }
 0x551   : > { %1785 = vsyncadd (!%p1486_p5), %s1182_s13, 4294967232  ;;  %s29_s14 = sadd.s32 1, %s2406_s12   ;;  %s2409_s21 = sld [smem:[#allocation27_spill]] }
 0x552   : > { %p26_p9 = scmp.ge.s32.totalorder %s29_s14, 4   ;;  %s2410_s12 = sld [smem:[#allocation22_spill]] }
 0x553   : > { %s2411_s13 = sld [smem:[#allocation26_spill]]  ;;  %s2412_s30 = smov %s1792_s10 }
 0x554   : > { %s2413_s10 = smov %s1796_s11  ;;  %28 = sbr.rel (!%p26_p9) target bundleno = 14 (0xe), region = 141 }
 0x557   : > { %s2414_s11 = smov %s2409_s21 }
 0x55b   :  { %1187 = vsyncpa [#allocation7], 1 }
 0x55c   :  { %1189 = vsyncpa [#allocation7 + $0x1], 1 }
 0x55d   :  { %1190 = vsyncpa [#allocation10], 1 }
 0x55e   :  { %1192 = vsyncpa [#allocation10 + $0x1], 1 }
 0x55f   :  { %1193 = vsyncpa [#allocation13], 1 }
 0x560   :  { %1194 = vsyncpa [#allocation8], 1 }
 0x561   :  { %1196 = vsyncpa [#allocation8 + $0x1], 1 }

</bundles_post_ra>
